<compile_context>
chip_gen: v7x
topology: tpu7x:2x2x1
jax: 0.10.0
libtpu: 0.0.40
codegen_flags: <defaults>
</compile_context>

<pallas_src>
import functools

import jax
import jax.numpy as jnp
from jax.experimental import pallas as pl
from jax.experimental.pallas import tpu as pltpu


def _round_up(x, m):
    return (x + m - 1) // m * m


@functools.lru_cache(maxsize=1)
def _vmem_capacity_bytes():
    try:
        info = pltpu.get_tpu_info()
        cap = getattr(info, "vmem_capacity_bytes", None)
        if cap:
            return int(cap)
    except Exception:
        pass
    return 64 * 1024 * 1024  # conservative default (v7x per-TensorCore VMEM)


def _gelu(h, approximate):
    # h is f32 (fc1 accumulator output).
    if approximate:
        # tanh approximation -> EUP slot; not bit-matching torch's exact GELU.
        c = jnp.float32(0.7978845608028654)  # sqrt(2/pi)
        return 0.5 * h * (1.0 + jnp.tanh(c * (h + jnp.float32(0.044715) * h * h * h)))
    inv_sqrt2 = jnp.float32(0.7071067811865476)
    return 0.5 * h * (1.0 + jax.lax.erf(h * inv_sqrt2))


def _mlp_kernel_resident(x_ref, w1_ref, b1_ref, w2_ref, b2_ref, o_ref, *, approximate):
    # Grid: (M tiles,) [parallel]. Weights/biases have constant block indices
    # -> DMAed from HBM once and kept resident in VMEM for the whole grid.
    # Writes directly to o_ref (no accumulator scratch / finalize copy).
    h = jnp.dot(x_ref[...], w1_ref[...], preferred_element_type=jnp.float32)
    h = _gelu(h + b1_ref[...], approximate)
    # Dropout(p=0.0) is identity in the forward pass -> no-op.
    y = jnp.dot(h.astype(w2_ref.dtype), w2_ref[...], preferred_element_type=jnp.float32)
    o_ref[...] = (y + b2_ref[...]).astype(o_ref.dtype)


def _mlp_kernel_ktiled(x_ref, w1_ref, b1_ref, w2_ref, b2_ref, o_ref, acc_ref, *,
                       approximate):
    # Grid: (M tiles [parallel], hidden tiles [arbitrary]). fc2 partial
    # products accumulate in an f32 scratch; output stored on the last k step.
    k = pl.program_id(1)

    @pl.when(k == 0)
    def _init():
        acc_ref[...] = jnp.zeros_like(acc_ref)

    h = jnp.dot(x_ref[...], w1_ref[...], preferred_element_type=jnp.float32)
    h = _gelu(h + b1_ref[...], approximate)
    acc_ref[...] += jnp.dot(h.astype(w2_ref.dtype), w2_ref[...],
                            preferred_element_type=jnp.float32)

    @pl.when(k == pl.num_programs(1) - 1)
    def _finalize():
        o_ref[...] = (acc_ref[...] + b2_ref[...]).astype(o_ref.dtype)


@functools.partial(jax.jit,
                   static_argnames=("tm", "th", "compute_dtype", "approximate_gelu"))
def mlp_pallas(x_nhwc, w1, b1, w2, b2, *, tm=None, th=None,
               compute_dtype="auto", approximate_gelu=False):
    """Fused Mlp forward.

    x_nhwc: (B, H, W, C_in) channels-last input.
    w1: (C_in, hidden)  [= torch fc1.weight.T],  b1: (hidden,)
    w2: (hidden, C_out) [= torch fc2.weight.T],  b2: (C_out,)
    tm: token-tile size (None -> auto per TPU generation, multiple of 8).
    th: hidden-tile size. None -> weights-resident path when it fits VMEM,
        otherwise auto-sized hidden tiling. Passing th forces hidden tiling.
    compute_dtype: "auto" -> bf16 matmul operands for f32 inputs with f32 MXU
        accumulation (performance default, not bit-matching torch f32), or an
        explicit dtype (e.g. jnp.float32 for exact torch-f32 semantics).
    approximate_gelu: tanh GELU approximation (EUP) instead of exact erf.
    """
    B, H, W, C_in = x_nhwc.shape
    hidden = w1.shape[1]
    C_out = w2.shape[1]
    M = B * H * W

    out_dtype = x_nhwc.dtype
    if compute_dtype == "auto":
        cdt = jnp.dtype(jnp.bfloat16) if out_dtype == jnp.float32 else jnp.dtype(out_dtype)
    else:
        cdt = jnp.dtype(compute_dtype)
    isz = cdt.itemsize
    osz = jnp.dtype(out_dtype).itemsize

    # Lane-dense channel dims; zero padding is exact (reduction dims, GELU(0)=0).
    Cin_p = _round_up(C_in, 128)
    Hid_p = _round_up(hidden, 128)
    Cout_p = _round_up(C_out, 128)

    # Generation-aware VMEM budget (v5e/v6e ~102 MiB, v7x ~51 MiB).
    vmem_cap = _vmem_capacity_bytes()
    budget = min(int(vmem_cap * 0.80), vmem_cap - (8 << 20))

    # Token-tile size: auto per generation, multiple of 8; keep >= 2 M tiles so
    # both v7x TensorCores get work on the "parallel" axis.
    if tm is None:
        tm = 1024 if vmem_cap >= (96 << 20) else 512
    tm = max(8, (int(tm) // 8) * 8)
    tm_eff = min(tm, _round_up(M, 8))
    if M > 8:
        tm_eff = min(tm_eff, max(8, _round_up((M + 1) // 2, 8)))
    num_m = -(-M // tm_eff)

    # Weights-resident footprint (Pallas double-buffers every input block).
    resident_bytes = (
        2 * tm_eff * Cin_p * isz + 2 * tm_eff * Cout_p * osz
        + 2 * (Cin_p * Hid_p * isz + Hid_p * Cout_p * isz + 8 * Hid_p * 4 + 8 * Cout_p * 4)
        + tm_eff * Hid_p * 4 + tm_eff * Hid_p * isz)  # GELU f32 + cast intermediates
    use_resident = (th is None) and (resident_bytes <= budget)

    th_eff = Hid_p
    if not use_resident:
        th_eff = Hid_p if th is None else min(_round_up(max(int(th), 128), 128), Hid_p)

        def _ktiled_bytes(t):
            return (2 * (tm_eff * Cin_p * isz + Cin_p * t * isz + t * Cout_p * isz
                         + 8 * t * 4 + 8 * Cout_p * 4 + tm_eff * Cout_p * osz)
                    + tm_eff * Cout_p * 4 + 2 * tm_eff * t * 4)

        # Shrink until it fits VMEM and divides Hid_p (th must divide Hid_p so
        # no garbage rows of w2 leak into the accumulator; 128 always works).
        while th_eff > 128 and (_ktiled_bytes(th_eff) > budget or Hid_p % th_eff != 0):
            th_eff -= 128
    num_k = Hid_p // th_eff

    # --- input prep: skip pads / casts that aren't needed (extra HBM passes) ---
    x2d = x_nhwc.reshape(M, C_in)
    if x2d.dtype != cdt:
        x2d = x2d.astype(cdt)
    if Cin_p != C_in:
        x2d = jnp.pad(x2d, ((0, 0), (0, Cin_p - C_in)))

    w1_p = w1 if w1.dtype == cdt else w1.astype(cdt)
    if (C_in, hidden) != (Cin_p, Hid_p):
        w1_p = jnp.pad(w1_p, ((0, Cin_p - C_in), (0, Hid_p - hidden)))
    w2_p = w2 if w2.dtype == cdt else w2.astype(cdt)
    if (hidden, C_out) != (Hid_p, Cout_p):
        w2_p = jnp.pad(w2_p, ((0, Hid_p - hidden), (0, Cout_p - C_out)))
    b1_p = b1.astype(jnp.float32)
    if hidden != Hid_p:
        b1_p = jnp.pad(b1_p, (0, Hid_p - hidden))
    b1_p = b1_p.reshape(1, Hid_p)
    b2_p = b2.astype(jnp.float32)
    if C_out != Cout_p:
        b2_p = jnp.pad(b2_p, (0, Cout_p - C_out))
    b2_p = b2_p.reshape(1, Cout_p)

    weight_bytes = w1_p.size * isz + w2_p.size * isz + b1_p.size * 4 + b2_p.size * 4
    flops = 2 * M * (Cin_p * Hid_p + Hid_p * Cout_p)
    trans = M * Hid_p
    out_bytes = M * Cout_p * osz

    if use_resident:
        cost = pl.CostEstimate(
            flops=flops, transcendentals=trans,
            bytes_accessed=x2d.size * isz + weight_bytes + out_bytes)
        out2d = pl.pallas_call(
            functools.partial(_mlp_kernel_resident, approximate=approximate_gelu),
            out_shape=jax.ShapeDtypeStruct((M, Cout_p), out_dtype),
            grid_spec=pltpu.PrefetchScalarGridSpec(
                num_scalar_prefetch=0,
                grid=(num_m,),
                in_specs=[
                    pl.BlockSpec((tm_eff, Cin_p), lambda i: (i, 0)),
                    pl.BlockSpec((Cin_p, Hid_p), lambda i: (0, 0)),
                    pl.BlockSpec((1, Hid_p), lambda i: (0, 0)),
                    pl.BlockSpec((Hid_p, Cout_p), lambda i: (0, 0)),
                    pl.BlockSpec((1, Cout_p), lambda i: (0, 0)),
                ],
                out_specs=pl.BlockSpec((tm_eff, Cout_p), lambda i: (i, 0)),
            ),
            compiler_params=pltpu.CompilerParams(
                dimension_semantics=("parallel",),
                vmem_limit_bytes=budget,
            ),
            cost_estimate=cost,
        )(x2d, w1_p, b1_p, w2_p, b2_p)
    else:
        # Hidden-tiled fallback: weights re-streamed once per M tile.
        # TODO(synk): if profiling shows exposed weight DMA here, add
        # pipeline_mode=pl.Buffered(3) on the w1/w2 BlockSpecs (VMEM permitting).
        cost = pl.CostEstimate(
            flops=flops, transcendentals=trans,
            bytes_accessed=x2d.size * isz + num_m * weight_bytes + out_bytes)
        out2d = pl.pallas_call(
            functools.partial(_mlp_kernel_ktiled, approximate=approximate_gelu),
            out_shape=jax.ShapeDtypeStruct((M, Cout_p), out_dtype),
            grid_spec=pltpu.PrefetchScalarGridSpec(
                num_scalar_prefetch=0,
                grid=(num_m, num_k),
                in_specs=[
                    pl.BlockSpec((tm_eff, Cin_p), lambda i, k: (i, 0)),
                    pl.BlockSpec((Cin_p, th_eff), lambda i, k: (0, k)),
                    pl.BlockSpec((1, th_eff), lambda i, k: (0, k)),
                    pl.BlockSpec((th_eff, Cout_p), lambda i, k: (k, 0)),
                    pl.BlockSpec((1, Cout_p), lambda i, k: (0, 0)),
                ],
                out_specs=pl.BlockSpec((tm_eff, Cout_p), lambda i, k: (i, 0)),
                scratch_shapes=[pltpu.VMEM((tm_eff, Cout_p), jnp.float32)],
            ),
            compiler_params=pltpu.CompilerParams(
                dimension_semantics=("parallel", "arbitrary"),
                vmem_limit_bytes=budget,
            ),
            cost_estimate=cost,
        )(x2d, w1_p, b1_p, w2_p, b2_p)

    if Cout_p != C_out:
        out2d = out2d[:, :C_out]
    return out2d.reshape(B, H, W, C_out)


def _reference_mlp(x_nhwc, w1, b1, w2, b2):
    hp = jax.lax.Precision.HIGHEST
    h = jnp.dot(x_nhwc, w1, precision=hp) + b1
    h = 0.5 * h * (1.0 + jax.lax.erf(h * jnp.float32(0.7071067811865476)))
    return jnp.dot(h, w2, precision=hp) + b2


def _make_params(key, in_features, hidden_features, out_features):
    kw1, kb1, kw2, kb2 = jax.random.split(key, 4)
    bound1 = 1.0 / (in_features ** 0.5)
    w1 = jax.random.uniform(kw1, (in_features, hidden_features),
                            minval=-bound1, maxval=bound1, dtype=jnp.float32)
    b1 = jax.random.uniform(kb1, (hidden_features,),
                            minval=-bound1, maxval=bound1, dtype=jnp.float32)
    bound2 = 1.0 / (hidden_features ** 0.5)
    w2 = jax.random.uniform(kw2, (hidden_features, out_features),
                            minval=-bound2, maxval=bound2, dtype=jnp.float32)
    b2 = jax.random.uniform(kb2, (out_features,),
                            minval=-bound2, maxval=bound2, dtype=jnp.float32)
    return w1, b1, w2, b2


if __name__ == "__main__":
    key = jax.random.PRNGKey(0)
    kx1, kx2, kx3, kp1, kp2, kp3 = jax.random.split(key, 6)

    # --- case 1: Mlp(in=32, hidden=64) on (2, 8, 8, 32) ------------------------
    B, H, W = 2, 8, 8
    in_f, hid_f, out_f = 32, 64, 32
    x = jax.random.normal(kx1, (B, H, W, in_f), dtype=jnp.float32)
    w1, b1, w2, b2 = _make_params(kp1, in_f, hid_f, out_f)
    ref = _reference_mlp(x, w1, b1, w2, b2)

    # exact f32 path (torch semantics), weights-resident
    out_exact = jax.block_until_ready(mlp_pallas(x, w1, b1, w2, b2,
                                                 compute_dtype=jnp.float32))
    assert out_exact.shape == (B, H, W, out_f)
    assert jnp.allclose(out_exact, ref, atol=1e-4, rtol=1e-4)

    # performance default: bf16 operands, f32 accumulation
    out_bf16 = jax.block_until_ready(mlp_pallas(x, w1, b1, w2, b2))
    assert jnp.allclose(out_bf16, ref, atol=5e-2, rtol=5e-2)

    # tanh-approximate GELU (EUP) path
    out_tanh = jax.block_until_ready(mlp_pallas(x, w1, b1, w2, b2,
                                                approximate_gelu=True))
    assert jnp.allclose(out_tanh, ref, atol=5e-2, rtol=5e-2)

    # --- case 2: ragged M, unaligned channels, forced hidden-tiled path --------
    B2, H2, W2 = 2, 24, 24                       # M = 1152
    in2, hid2, out2 = 48, 192, 48
    x_b = jax.random.normal(kx2, (B2, H2, W2, in2), dtype=jnp.float32)
    w1b, b1b, w2b, b2b = _make_params(kp2, in2, hid2, out2)
    ref_b = _reference_mlp(x_b, w1b, b1b, w2b, b2b)

    out_b = jax.block_until_ready(mlp_pallas(x_b, w1b, b1b, w2b, b2b,
                                             compute_dtype=jnp.float32, th=128))
    assert out_b.shape == (B2, H2, W2, out2)
    assert jnp.allclose(out_b, ref_b, atol=1e-4, rtol=1e-4)

    # same shapes via the auto (weights-resident, bf16) path
    out_b2 = jax.block_until_ready(mlp_pallas(x_b, w1b, b1b, w2b, b2b))
    assert jnp.allclose(out_b2, ref_b, atol=5e-2, rtol=5e-2)

    # --- case 3: 128-aligned channels -> zero wrapper pad/cast HBM passes ------
    in3, hid3, out3 = 128, 256, 128
    x_c = jax.random.normal(kx3, (2, 8, 8, in3), dtype=jnp.float32)
    w1c, b1c, w2c, b2c = _make_params(kp3, in3, hid3, out3)
    ref_c = _reference_mlp(x_c, w1c, b1c, w2c, b2c)
    out_c = jax.block_until_ready(mlp_pallas(x_c, w1c, b1c, w2c, b2c,
                                             compute_dtype=jnp.float32))
    assert out_c.shape == (2, 8, 8, out3)
    assert jnp.allclose(out_c, ref_c, atol=1e-4, rtol=1e-4)

    print("KERNEL_OK")
</pallas_src>

<mosaic_0001>
module attributes {stable_mosaic.version = 11 : i64} {
  func.func @_mlp_kernel_resident(%arg0: i32, %arg1: memref<64x128xf32, #tpu.memory_space<vmem>>, %arg2: memref<128x128xf32, #tpu.memory_space<vmem>>, %arg3: memref<1x128xf32, #tpu.memory_space<vmem>>, %arg4: memref<128x128xf32, #tpu.memory_space<vmem>>, %arg5: memref<1x128xf32, #tpu.memory_space<vmem>>, %arg6: memref<64x128xf32, #tpu.memory_space<vmem>>) attributes {dimension_semantics = [#tpu.dimension_semantics<parallel>], iteration_bounds = array<i64: 2>, scalar_prefetch = 0 : i64, scratch_operands = 0 : i64, tpu.core_type = #tpu.core_type<tc>, window_params = [{transform_indices = @transform_0, window_bounds = array<i64: 64, 128>}, {pipeline_mode = #tpu.pipeline_mode<synchronous>, transform_indices = @transform_1, window_bounds = array<i64: 128, 128>}, {pipeline_mode = #tpu.pipeline_mode<synchronous>, transform_indices = @transform_2, window_bounds = array<i64: 1, 128>}, {pipeline_mode = #tpu.pipeline_mode<synchronous>, transform_indices = @transform_3, window_bounds = array<i64: 128, 128>}, {pipeline_mode = #tpu.pipeline_mode<synchronous>, transform_indices = @transform_4, window_bounds = array<i64: 1, 128>}, {transform_indices = @transform_5, window_bounds = array<i64: 64, 128>}]} {
    %c0 = arith.constant 0 : index
    %c0_0 = arith.constant 0 : index
    %0 = vector.load %arg1[%c0, %c0_0] : memref<64x128xf32, #tpu.memory_space<vmem>>, vector<64x128xf32>
    %c0_1 = arith.constant 0 : index
    %c0_2 = arith.constant 0 : index
    %1 = vector.load %arg2[%c0_1, %c0_2] : memref<128x128xf32, #tpu.memory_space<vmem>>, vector<128x128xf32>
    %cst = arith.constant dense<0.000000e+00> : vector<64x128xf32>
    %2 = tpu.matmul %0, %1, %cst {dimension_numbers = #tpu.dot_dimension_numbers<[1], [0], [0], [1], [0, 0, 1, 1], [], []>} : vector<64x128xf32>, vector<128x128xf32>, vector<64x128xf32> -> vector<64x128xf32>
    %c0_3 = arith.constant 0 : index
    %c0_4 = arith.constant 0 : index
    %3 = vector.load %arg3[%c0_3, %c0_4] : memref<1x128xf32, #tpu.memory_space<vmem>>, vector<1x128xf32>
    %4 = vector.broadcast %3 : vector<1x128xf32> to vector<64x128xf32>
    %5 = arith.addf %2, %4 : vector<64x128xf32>
    %cst_5 = arith.constant 5.000000e-01 : f32
    %6 = vector.broadcast %cst_5 : f32 to vector<64x128xf32>
    %7 = arith.mulf %6, %5 : vector<64x128xf32>
    %cst_6 = arith.constant 0.707106769 : f32
    %8 = vector.broadcast %cst_6 : f32 to vector<64x128xf32>
    %9 = arith.mulf %5, %8 : vector<64x128xf32>
    %10 = math.erf %9 : vector<64x128xf32>
    %cst_7 = arith.constant 1.000000e+00 : f32
    %11 = vector.broadcast %cst_7 : f32 to vector<64x128xf32>
    %12 = arith.addf %11, %10 : vector<64x128xf32>
    %13 = arith.mulf %7, %12 : vector<64x128xf32>
    %c0_8 = arith.constant 0 : index
    %c0_9 = arith.constant 0 : index
    %14 = vector.load %arg4[%c0_8, %c0_9] : memref<128x128xf32, #tpu.memory_space<vmem>>, vector<128x128xf32>
    %cst_10 = arith.constant dense<0.000000e+00> : vector<64x128xf32>
    %15 = tpu.matmul %13, %14, %cst_10 {dimension_numbers = #tpu.dot_dimension_numbers<[1], [0], [0], [1], [0, 0, 1, 1], [], []>} : vector<64x128xf32>, vector<128x128xf32>, vector<64x128xf32> -> vector<64x128xf32>
    %c0_11 = arith.constant 0 : index
    %c0_12 = arith.constant 0 : index
    %16 = vector.load %arg5[%c0_11, %c0_12] : memref<1x128xf32, #tpu.memory_space<vmem>>, vector<1x128xf32>
    %17 = vector.broadcast %16 : vector<1x128xf32> to vector<64x128xf32>
    %18 = arith.addf %15, %17 : vector<64x128xf32>
    %c0_13 = arith.constant 0 : index
    %c0_14 = arith.constant 0 : index
    %19 = vector.load %arg6[%c0_13, %c0_14] : memref<64x128xf32, #tpu.memory_space<vmem>>, vector<64x128xf32>
    tpu.vector_store %arg6[%c0_13, %c0_14], %18 {strides = array<i32>} : memref<64x128xf32, #tpu.memory_space<vmem>>, vector<64x128xf32>,
    return
  }
  func.func @transform_0(%arg0: i32) -> (i32, i32) {
    %c0_i32 = arith.constant 0 : i32
    %c0_i32_0 = arith.constant 0 : i32
    return %arg0, %c0_i32 : i32, i32
  }
  func.func @transform_1(%arg0: i32) -> (i32, i32) {
    %c0_i32 = arith.constant 0 : i32
    %c0_i32_0 = arith.constant 0 : i32
    %c0_i32_1 = arith.constant 0 : i32
    return %c0_i32, %c0_i32_0 : i32, i32
  }
  func.func @transform_2(%arg0: i32) -> (i32, i32) {
    %c0_i32 = arith.constant 0 : i32
    %c0_i32_0 = arith.constant 0 : i32
    %c0_i32_1 = arith.constant 0 : i32
    return %c0_i32, %c0_i32_0 : i32, i32
  }
  func.func @transform_3(%arg0: i32) -> (i32, i32) {
    %c0_i32 = arith.constant 0 : i32
    %c0_i32_0 = arith.constant 0 : i32
    %c0_i32_1 = arith.constant 0 : i32
    return %c0_i32, %c0_i32_0 : i32, i32
  }
  func.func @transform_4(%arg0: i32) -> (i32, i32) {
    %c0_i32 = arith.constant 0 : i32
    %c0_i32_0 = arith.constant 0 : i32
    %c0_i32_1 = arith.constant 0 : i32
    return %c0_i32, %c0_i32_0 : i32, i32
  }
  func.func @transform_5(%arg0: i32) -> (i32, i32) {
    %c0_i32 = arith.constant 0 : i32
    %c0_i32_0 = arith.constant 0 : i32
    return %arg0, %c0_i32 : i32, i32
  }
}

</mosaic_0001>

<bundles_post_ra>
// kernel: mlp_pallas.1
= control target key start
LH: loop header
LB: loop body
LE: loop exit
PB: predicated region body
PF: predicated region fallthrough
CT: control target
= control target key end

     0   :  { %10 = vsyncpa [#allocation3], 0  ;;  %s1201_s0 = inlined_call_operand.vmem [shape: f32[128,128], index: 0, kind: input, shape index: {}]   ;;  %s1202_s1 = inlined_call_operand.vmem [shape: f32[128,128], index: 1, kind: input, shape index: {}]   ;;  %s1203_s2 = inlined_call_operand.vmem [shape: f32[1,128], index: 2, kind: input, shape index: {}]   ;;  %s1204_s3 = inlined_call_operand.vmem [shape: f32[128,128], index: 3, kind: input, shape index: {}]   ;;  %s1205_s4 = inlined_call_operand.vmem [shape: f32[1,128], index: 4, kind: input, shape index: {}]   ;;  %s1206_s5 = inlined_call_operand.hbm [shape: f32[128,128], index: 5, kind: output, shape index: {}]  }
   0x1   :  { %12 = vsyncpa [#allocation3 + $0x1], 0  ;;  %s983_s18 = smov 0   ;;  %s985_s19 = smov 0  }
   0x2   :  { %s987_s20 = smov 0   ;;  %s989_s21 = smov 0  }
   0x3 LB: > { %s1004_s22 = sadd.s32 4294967295, %s948_s21   ;;  %s614_s23 = sadd.s32 4294967294, %s948_s21   ;;  %s948_s21 = sphi %s989_s21, %s1212_s21   ;;  %s944_s20 = sphi %s987_s20, %s1211_s20   ;;  %s940_s19 = sphi %s985_s19, %s1210_s19   ;;  %s936_s18 = sphi %s983_s18, %s1209_s18  }
   0x4   : > { %s1008_s24 = sadd.s32 1, %s948_s21   ;;  %s135_s25 = sadd.s32 1, %s944_s20 }
   0x5   : > { %s132_s26 = ssub.s32 %s948_s21, %s1008_s24  ;;  %p145_p0 = scmp.ne.s32.totalorder %s944_s20, %s940_s19 }
   0x6   : > { %p133_p1 = scmp.eq.s32.totalorder %s132_s26, 0  ;;  %p146_p2 = scmp.eq.s32.totalorder %s1004_s22, 1 }
   0x7   : > { %p151_p3 = scmp.ne.s32.totalorder %s940_s19, %s936_s18  ;;  %p152_p4 = scmp.eq.s32.totalorder %s614_s23, 1 }
   0x8   : > { %s1019_s27 = scalar_select %p133_p1, %s944_s20, %s135_s25  }
   0x9   : > { %p1021_p5 = por %p146_p2, %p145_p0  ;;  %p1025_p6 = por %p152_p4, %p151_p3 }
   0xa   : > { %p617_p7 = scmp.ge.s32.totalorder %s948_s21, 1  ;;  %p191_p8 = scmp.lt.s32.totalorder %s948_s21, 3 }
   0xc   : > { %p192_p9 = pnand %p617_p7, %p191_p8 }
   0xd   : > { %v234_v0 = vld [vmem:[%s1202_s1] sm:$0xff] (!%p192_p9)  ;;  %v235_v1 = vld [vmem:[%s1202_s1 + $0x8] sm:$0xff] (!%p192_p9)  ;;  %v236_v2 = vld [vmem:[%s1202_s1 + $0x10] sm:$0xff] (!%p192_p9)  ;;  %s619_s11 = sshll.u32 (!%p192_p9), %s1004_s22, 3  ;;  %s628_s23 = sshll.u32 (!%p192_p9), %s1004_s22, 10 }
   0xe   : > { %195 = sbr.rel (%p192_p9) target bundleno = 523 (0x20b), region = 40  ;;  %v765_v3 = vpack.c.bf16 (!%p192_p9), %v235_v1, %v234_v0  ;;  %v237_v4 = vld [vmem:[%s1202_s1 + $0x18] sm:$0xff] (!%p192_p9)  ;;  %p220_p10 = scmp.lt.s32.totalorder (!%p192_p9), %s619_s11, 15  ;;  %v238_v6 = vld [vmem:[%s1202_s1 + $0x20] sm:$0xff] (!%p192_p9)  ;;  %v239_v7 = vld [vmem:[%s1202_s1 + $0x28] sm:$0xff] (!%p192_p9) }
   0xf   : > { %v769_v5 = vpack.c.bf16 (!%p192_p9), %v237_v4, %v236_v2  ;;  %v773_v8 = vpack.c.bf16 (!%p192_p9), %v239_v7, %v238_v6  ;;  %v240_v9 = vld [vmem:[%s1202_s1 + $0x30] sm:$0xff] (!%p192_p9)  ;;  %v402_v10 = vld [vmem:[%s1204_s3] sm:$0xff] (!%p192_p9)  ;;  %v403_v11 = vld [vmem:[%s1204_s3 + $0x8] sm:$0xff] (!%p192_p9)  ;;  %s1154_s6 = scalar_lea.hbm (!%p192_p9), %s1206_s5, %s628_s23  ;;  %s950_s8 = smov (!%p192_p9), [#allocation2]  }
  0x10   : > { %766 = vmatprep.subr.bf16.mxu0 (!%p192_p9), %v765_v3  ;;  %v241_v12 = vld [vmem:[%s1202_s1 + $0x38] sm:$0xff] (!%p192_p9)  ;;  %v797_v13 = vpack.c.bf16 (!%p192_p9), %v403_v11, %v402_v10  ;;  %v404_v14 = vld [vmem:[%s1204_s3 + $0x10] sm:$0xff] (!%p192_p9)  ;;  %v406_v18 = vld [vmem:[%s1204_s3 + $0x20] sm:$0xff] (!%p192_p9)  ;;  %s890_s9 = sshll.u32 (!%p192_p9), %s950_s8, 4  ;;  %s891_s9 = int_to_ptr.vmem [resolvable:$false] %s890_s9 }
  0x11   : > { %768 = vmatpush3.bf16.msra.mxu0 (!%p192_p9), %v765_v3  ;;  %v405_v15 = vld [vmem:[%s1204_s3 + $0x18] sm:$0xff] (!%p192_p9)  ;;  %v777_v19 = vpack.c.bf16 (!%p192_p9), %v241_v12, %v240_v9  ;;  %v407_v20 = vld [vmem:[%s1204_s3 + $0x28] sm:$0xff] (!%p192_p9)  ;;  %v242_v21 = vld [vmem:[%s1202_s1 + $0x40] sm:$0xff] (!%p192_p9)  ;;  %s892_s10 = scalar_lea.vmem (!%p192_p9), %s891_s9, 2048 }
  0x12   : > { %770 = vmatprep.subr.bf16.mxu0 (!%p192_p9), %v769_v5  ;;  %v801_v17 = vpack.c.bf16 (!%p192_p9), %v405_v15, %v404_v14  ;;  %798 = vmatprep.subr.bf16.mxu1 (!%p192_p9), %v797_v13  ;;  %v243_v22 = vld [vmem:[%s1202_s1 + $0x48] sm:$0xff] (!%p192_p9)  ;;  %v805_v23 = vpack.c.bf16 (!%p192_p9), %v407_v20, %v406_v18  ;;  %v244_v25 = vld [vmem:[%s1202_s1 + $0x50] sm:$0xff] (!%p192_p9)  ;;  %v245_v26 = vld [vmem:[%s1202_s1 + $0x58] sm:$0xff] (!%p192_p9) }
  0x13   : > { %800 = vmatpush3.bf16.msra.mxu1 (!%p192_p9), %v797_v13  ;;  %v781_v24 = vpack.c.bf16 (!%p192_p9), %v243_v22, %v242_v21  ;;  %v785_v27 = vpack.c.bf16 (!%p192_p9), %v245_v26, %v244_v25  ;;  %v246_v28 = vld [vmem:[%s1202_s1 + $0x60] sm:$0xff] (!%p192_p9)  ;;  %v247_v29 = vld [vmem:[%s1202_s1 + $0x68] sm:$0xff] (!%p192_p9)  ;;  %v248_v31 = vld [vmem:[%s1202_s1 + $0x70] sm:$0xff] (!%p192_p9) }
  0x14   : > { %802 = vmatprep.subr.bf16.mxu1 (!%p192_p9), %v801_v17  ;;  %v789_v30 = vpack.c.bf16 (!%p192_p9), %v247_v29, %v246_v28  ;;  %v249_v32 = vld [vmem:[%s1202_s1 + $0x78] sm:$0xff] (!%p192_p9)  ;;  %v408_v41 = vld [vmem:[%s1204_s3 + $0x30] sm:$0xff] (!%p192_p9)  ;;  %v410_v44 = vld [vmem:[%s1204_s3 + $0x40] sm:$0xff] (!%p192_p9) }
  0x15   : > { %s1214_s11 = smov (!%p220_p10, %s619_s11), 15  ;;  %772 = vmatpush3.bf16.msra.mxu0 %v769_v5  ;;  %v793_v33 = vpack.c.bf16 %v249_v32, %v248_v31  ;;  %v409_v42 = vld [vmem:[%s1204_s3 + $0x38] sm:$0xff]  ;;  %v411_v45 = vld [vmem:[%s1204_s3 + $0x48] sm:$0xff]  ;;  %v412_v47 = vld [vmem:[%s1204_s3 + $0x50] sm:$0xff] }
  0x16   : > { %s620_s26 = sshll.u32 %s1214_s11, 3  ;;  %774 = vmatprep.subr.bf16.mxu0 %v773_v8  ;;  %v809_v43 = vpack.c.bf16 %v409_v42, %v408_v41  ;;  %v813_v46 = vpack.c.bf16 %v411_v45, %v410_v44  ;;  %v413_v48 = vld [vmem:[%s1204_s3 + $0x58] sm:$0xff]  ;;  %v414_v50 = vld [vmem:[%s1204_s3 + $0x60] sm:$0xff]  ;;  %v415_v51 = vld [vmem:[%s1204_s3 + $0x68] sm:$0xff]  ;;  %s216_s11 = sand.u32 1, %s940_s19  }
  0x17   : > { %s1065_s14 = scalar_lea.vmem %s1201_s0, %s620_s26  ;;  %804 = vmatpush3.bf16.msra.mxu1 %v801_v17  ;;  %v817_v49 = vpack.c.bf16 %v413_v48, %v412_v47  ;;  %v821_v52 = vpack.c.bf16 %v415_v51, %v414_v50  ;;  %v416_v53 = vld [vmem:[%s1204_s3 + $0x70] sm:$0xff]  ;;  %v417_v54 = vld [vmem:[%s1204_s3 + $0x78] sm:$0xff]  ;;  %v621_v56 = vld [vmem:[%s1203_s2] ss:$0 sm:$0xff]  ;;  %s618_s15 = sshll.u32 %s216_s11, 6 }
  0x18   : > { %v226_v16 = vld [vmem:[%s1065_s14] sm:$0xff]  ;;  %806 = vmatprep.subr.bf16.mxu1 %v805_v23  ;;  %v227_v34 = vld [vmem:[%s1065_s14 + $0x8] sm:$0xff]  ;;  %v228_v35 = vld [vmem:[%s1065_s14 + $0x10] sm:$0xff]  ;;  %v825_v55 = vpack.c.bf16 %v417_v54, %v416_v53  ;;  %s218_s17 = scalar_lea.vmem [#allocation2], %s618_s15  ;;  %s1160_s22 = scalar_lea.sflag [#allocation3], %s216_s11 }
  0x19   : > { %709 = vmatprep.mubr.f32.mxu0 %v226_v16  ;;  %776 = vmatpush3.bf16.msra.mxu0 %v773_v8  ;;  %v229_v36 = vld [vmem:[%s1065_s14 + $0x18] sm:$0xff]  ;;  %v230_v37 = vld [vmem:[%s1065_s14 + $0x20] sm:$0xff]  ;;  %v231_v38 = vld [vmem:[%s1065_s14 + $0x28] sm:$0xff]  ;;  %s552_s25 = sshll.u32 %s218_s17, 4  ;;  %s1156_s25 = int_to_ptr.vmem [resolvable:$true] %s552_s25 }
  0x1a   : > { %778 = vmatprep.subr.bf16.mxu0 %v777_v19  ;;  %v232_v39 = vld [vmem:[%s1065_s14 + $0x30] sm:$0xff]  ;;  %v233_v40 = vld [vmem:[%s1065_s14 + $0x38] sm:$0xff]  ;;  %s886_s7 = scalar_lea.vmem %s1156_s25, 1024  ;;  %p893_p0 = scmp.lt.s32.totalorder %s1156_s25, %s891_s9 }
  0x1b   : > { %808 = vmatpush3.bf16.msra.mxu1 %v805_v23  ;;  %p887_p11 = scmp.ne.s32.totalorder %s1156_s25, %s886_s7  ;;  %p894_p1 = scmp.lt.s32.totalorder %s892_s10, %s886_s7 }
  0x1c   : > { %810 = vmatprep.subr.bf16.mxu1 %v809_v43 }
  0x1d   : > { %780 = vmatpush3.bf16.msra.mxu0 %v777_v19  ;;  %p888_p12 = pnand %p887_p11, %p1021_p5  ;;  %p895_p2 = por %p894_p1, %p893_p0 }
  0x1e   : > { %782 = vmatprep.subr.bf16.mxu0 %v781_v24 }
  0x1f   : > { %812 = vmatpush3.bf16.msra.mxu1 %v809_v43  ;;  %p889_p13 = pneg %p888_p12 }
  0x20   : > { %814 = vmatprep.subr.bf16.mxu1 %v813_v46 }
  0x21   : > { %784 = vmatpush3.bf16.msra.mxu0 %v781_v24  ;;  %p896_p3 = pnand %p895_p2, %p889_p13 }
  0x22   : > { %786 = vmatprep.subr.bf16.mxu0 %v785_v27 }
  0x23   : > { %816 = vmatpush3.bf16.msra.mxu1 %v813_v46 }
  0x24   : > { %818 = vmatprep.subr.bf16.mxu1 %v817_v49 }
  0x25   : > { %788 = vmatpush3.bf16.msra.mxu0 %v785_v27 }
  0x26   : > { %790 = vmatprep.subr.bf16.mxu0 %v789_v30 }
  0x27   : > { %820 = vmatpush3.bf16.msra.mxu1 %v817_v49  ;;  %v622_v49 = vld [vmem:[%s1205_s4] ss:$0 sm:$0xff] }
  0x28   : > { %822 = vmatprep.subr.bf16.mxu1 %v821_v52 }
  0x29   : > { %792 = vmatpush3.bf16.msra.mxu0 %v789_v30 }
  0x2a   : > { %794 = vmatprep.subr.bf16.mxu0 %v793_v33 }
  0x2b   : > { %824 = vmatpush3.bf16.msra.mxu1 %v821_v52 }
  0x2c   : > { %826 = vmatprep.subr.bf16.mxu1 %v825_v55 }
  0x2d   : > { %796 = vmatpush3.bf16.msra.mxu0 %v793_v33 }
  0x2f   : > { %828 = vmatpush3.bf16.msra.mxu1 %v825_v55 }
  0x30   : > { %710 = vmatmul.mubr.f32.vlgmr.msra.gmra.mrb[0].mxu0 %v227_v34 }
  0x31   : > { %712 = vmatprep.mubr.f32.mxu0 %v228_v35 }
  0x34   : > { %713 = vmatmul.mubr.f32.gmra.mrb[2].mxu0 %v229_v36 }
  0x35   : > { %715 = vmatprep.mubr.f32.mxu0 %v230_v37 }
  0x38   : > { %716 = vmatmul.mubr.f32.gmra.mrb[4].mxu0 %v231_v38 }
  0x39   : > { %718 = vmatprep.mubr.f32.mxu0 %v232_v39 }
  0x3c   : > { %719 = vmatmul.mubr.f32.gmra.mrb[6].mxu0 %v233_v40 }
 0x103   : > { %v711_v57 = vpop.f32.mrb[0].mxu0 }
 0x104   : > { %v329_v58 = vadd.f32 %v711_v57, %v621_v56  ;;  %v323_v59 = vpop.f32.mrb[1].mxu0 }
 0x105   : > { %v324_v60 = vadd.f32 %v621_v56, %v323_v59 }
 0x106   : > { %v371_v61 = vmul.f32 0.70710677, %v329_v58  ;;  %v363_v22 = vmul.f32 0.5, %v329_v58 }
 0x107   : > { %v370_v62 = vmul.f32 0.70710677, %v324_v60  ;;  %v714_v63 = vpop.f32.mrb[2].mxu0  ;;  %v362_v20 = vmul.f32 0.5, %v324_v60 }
 0x108   : > { %870 = verf.f32 %v371_v61  ;;  %v339_v0 = vadd.f32 %v714_v63, %v621_v56  ;;  %v333_v1 = vpop.f32.mrb[3].mxu0 }
 0x109   : > { %872 = verf.f32 %v370_v62  ;;  %v334_v2 = vadd.f32 %v621_v56, %v333_v1 }
 0x10a   : > { %v373_v3 = vmul.f32 0.70710677, %v339_v0  ;;  %v365_v30 = vmul.f32 0.5, %v339_v0 }
 0x10b   : > { %v372_v4 = vmul.f32 0.70710677, %v334_v2  ;;  %v717_v5 = vpop.f32.mrb[4].mxu0  ;;  %v364_v28 = vmul.f32 0.5, %v334_v2 }
 0x10c   : > { %874 = verf.f32 %v373_v3  ;;  %v349_v6 = vadd.f32 %v717_v5, %v621_v56  ;;  %v343_v7 = vpop.f32.mrb[5].mxu0 }
 0x10d   : > { %876 = verf.f32 %v372_v4  ;;  %v344_v8 = vadd.f32 %v621_v56, %v343_v7 }
 0x10e   : > { %v375_v9 = vmul.f32 0.70710677, %v349_v6  ;;  %v367_v38 = vmul.f32 0.5, %v349_v6 }
 0x10f   : > { %v374_v10 = vmul.f32 0.70710677, %v344_v8  ;;  %v720_v11 = vpop.f32.mrb[6].mxu0  ;;  %v366_v36 = vmul.f32 0.5, %v344_v8 }
 0x110   : > { %878 = verf.f32 %v375_v9  ;;  %v359_v12 = vadd.f32 %v720_v11, %v621_v56  ;;  %v353_v13 = vpop.f32.mrb[7].mxu0 }
 0x111   : > { %880 = verf.f32 %v374_v10  ;;  %v354_v14 = vadd.f32 %v621_v56, %v353_v13 }
 0x112   : > { %v871_v15 = vpop.eup %870  ;;  %v377_v16 = vmul.f32 0.70710677, %v359_v12  ;;  %v369_v46 = vmul.f32 0.5, %v359_v12 }
 0x113   : > { %v873_v17 = vpop.eup %872  ;;  %v387_v18 = vadd.f32 1.0, %v871_v15  ;;  %v376_v19 = vmul.f32 0.70710677, %v354_v14  ;;  %v368_v44 = vmul.f32 0.5, %v354_v14 }
 0x114   : > { %882 = verf.f32 %v377_v16  ;;  %v386_v21 = vadd.f32 1.0, %v873_v17 }
 0x115   : > { %884 = verf.f32 %v376_v19  ;;  %v395_v27 = vmul.f32 %v387_v18, %v363_v22 }
 0x116   : > { %v875_v23 = vpop.eup %874  ;;  %v394_v24 = vmul.f32 %v386_v21, %v362_v20 }
 0x117   : > { %v877_v25 = vpop.eup %876  ;;  %v389_v26 = vadd.f32 1.0, %v875_v23 }
 0x118   : > { %v388_v29 = vadd.f32 1.0, %v877_v25  ;;  %753 = vmatprep.mubr.f32.mxu1 %v394_v24 }
 0x119   : > { %754 = vmatmul.mubr.f32.vlgmr.msra.gmra.mrb[0].mxu1 %v395_v27  ;;  %v397_v35 = vmul.f32 %v389_v26, %v365_v30 }
 0x11a   : > { %v879_v31 = vpop.eup %878  ;;  %v396_v32 = vmul.f32 %v388_v29, %v364_v28 }
 0x11b   : > { %v881_v33 = vpop.eup %880  ;;  %v391_v34 = vadd.f32 1.0, %v879_v31 }
 0x11c   : > { %v390_v37 = vadd.f32 1.0, %v881_v33  ;;  %756 = vmatprep.mubr.f32.mxu1 %v396_v32 }
 0x11d   : > { %757 = vmatmul.mubr.f32.gmra.mrb[2].mxu1 %v397_v35  ;;  %v399_v43 = vmul.f32 %v391_v34, %v367_v38 }
 0x11e   : > { %v883_v39 = vpop.eup %882  ;;  %v398_v40 = vmul.f32 %v390_v37, %v366_v36 }
 0x11f   : > { %v885_v41 = vpop.eup %884  ;;  %v393_v42 = vadd.f32 1.0, %v883_v39 }
 0x120   : > { %v392_v45 = vadd.f32 1.0, %v885_v41  ;;  %759 = vmatprep.mubr.f32.mxu1 %v398_v40 }
 0x121   : > { %760 = vmatmul.mubr.f32.gmra.mrb[4].mxu1 %v399_v43  ;;  %v401_v48 = vmul.f32 %v393_v42, %v369_v46 }
 0x122   : > { %v400_v47 = vmul.f32 %v392_v45, %v368_v44 }
 0x124   : > { %762 = vmatprep.mubr.f32.mxu1 %v400_v47 }
 0x125   : > { %763 = vmatmul.mubr.f32.gmra.mrb[6].mxu1 %v401_v48 }
 0x1ec   : > { %v755_v50 = vpop.f32.mrb[0].mxu1 }
 0x1ed   : > { %v497_v51 = vadd.f32 %v755_v50, %v622_v49  ;;  %v491_v52 = vpop.f32.mrb[1].mxu1 }
 0x1ee   : > { %v492_v53 = vadd.f32 %v622_v49, %v491_v52 }
 0x1ef   : > { %531 = vst [vmem:[%s218_s17 + $0x8] sm:$0xff] %v497_v51 }
 0x1f0   : > { %530 = vst [vmem:[%s218_s17] sm:$0xff] %v492_v53  ;;  %v758_v54 = vpop.f32.mrb[2].mxu1 }
 0x1f1   : > { %v507_v55 = vadd.f32 %v758_v54, %v622_v49  ;;  %v501_v56 = vpop.f32.mrb[3].mxu1 }
 0x1f2   : > { %v502_v57 = vadd.f32 %v622_v49, %v501_v56 }
 0x1f3   : > { %533 = vst [vmem:[%s218_s17 + $0x18] sm:$0xff] %v507_v55 }
 0x1f4   : > { %532 = vst [vmem:[%s218_s17 + $0x10] sm:$0xff] %v502_v57  ;;  %v761_v58 = vpop.f32.mrb[4].mxu1 }
 0x1f5   : > { %v517_v59 = vadd.f32 %v761_v58, %v622_v49  ;;  %v511_v60 = vpop.f32.mrb[5].mxu1 }
 0x1f6   : > { %v512_v61 = vadd.f32 %v622_v49, %v511_v60 }
 0x1f7   : > { %535 = vst [vmem:[%s218_s17 + $0x28] sm:$0xff] %v517_v59 }
 0x1f8   : > { %534 = vst [vmem:[%s218_s17 + $0x20] sm:$0xff] %v512_v61  ;;  %v764_v62 = vpop.f32.mrb[6].mxu1 }
 0x1f9   : > { %v527_v63 = vadd.f32 %v764_v62, %v622_v49  ;;  %v521_v0 = vpop.f32.mrb[7].mxu1 }
 0x1fa   : > { %v522_v1 = vadd.f32 %v622_v49, %v521_v0 }
 0x1fb   : > { %537 = vst [vmem:[%s218_s17 + $0x38] sm:$0xff] %v527_v63 }
 0x1fc   : > { %536 = vst [vmem:[%s218_s17 + $0x30] sm:$0xff] %v522_v1 }
 0x1fd   : > { %899 = shalt.err (!%p896_p3)
}
 0x1fe   : > { %s900_s12 = scalar_lea.hbm %s1154_s6, 1024  ;;  %s904_s15 = scalar_lea.hbm %s1206_s5, 2048 }
 0x1ff   : > { %p901_p4 = scmp.ne.s32.totalorder %s1154_s6, %s900_s12  ;;  %p905_p9 = scmp.lt.u32.totalorder %s1154_s6, %s1206_s5 }
 0x200   : > { %p906_p10 = scmp.lt.u32.totalorder %s904_s15, %s900_s12  ;;  %p908_p12 = scmp.lt.u32.totalorder %s900_s12, %s1154_s6 }
 0x201   : > { %p902_p7 = pnand %p901_p4, %p1021_p5 }
 0x202   : > { %p907_p11 = por %p906_p10, %p905_p9 }
 0x203   : > { %p903_p8 = pneg %p902_p7 }
 0x204   : > { %p909_p13 = por %p908_p12, %p907_p11 }
 0x206   : > { %p910_p0 = pnand %p909_p13, %p903_p8 }
 0x208   : > { %913 = shalt.err (!%p910_p0)
}
 0x209   : > { %s951_s17 = smov 128   ;;  %s952_s23 = smov 8  }
 0x20a   : > { %829 = dma.vmem_to_hbm [thread:$0]  (%p1021_p5), %s1156_s25, 1024, %s1154_s6, %s1160_s22, %s951_s17, %s951_s17, %s952_s23  }
 0x20b PF: > { %p835_p1 = scmp.ge.s32.totalorder %s948_s21, 2  ;;  %s567_s26 = sand.u32 1, %s936_s18  }
 0x20c   : > { %s568_s30 = scalar_lea.sflag [#allocation3], %s567_s26 }
 0x20d   : > { %p832_p2 = pnand %p835_p1, %p1025_p6 }
 0x20f   : > { %931 = dma.done.wait (!%p832_p2), %s568_s30, 1024  }
 0x210   : > { %933 = vsyncadd (!%p832_p2), %s568_s30, 4294966272  ;;  %p15_p3 = scmp.ge.s32.totalorder %s1008_s24, 4   ;;  %s1209_s18 = smov %s940_s19 }
 0x211   : > { %s1210_s19 = smov %s944_s20  ;;  %s1211_s20 = smov %s1019_s27 }
 0x212   : > { %s1212_s21 = smov %s1008_s24  ;;  %17 = sbr.rel (!%p15_p3) target bundleno = 3 (0x3), region = 75 }
 0x219   :  { %573 = vsyncpa [#allocation3], 1 }
 0x21a   :  { %575 = vsyncpa [#allocation3 + $0x1], 1 }

</bundles_post_ra>
